<compile_context>
chip_gen: v5e
topology: v5e:2x2
jax: 0.10.0
libtpu: 0.0.40
codegen_flags: <defaults>
</compile_context>

<pallas_src>
import jax
import jax.numpy as jnp
from jax.experimental import pallas as pl
from jax.experimental.pallas import tpu as pltpu


_LANES = 128              # vreg lane width
_MAX_TILE_ROWS = 4096     # 4096 x 128 f32 = 2 MiB/block (8 MiB double-buffered in+out)
_SMALL_BATCH_ELEMS = 1024 # below this, plain XLA fused multiply-add wins


def _affine_kernel(w_ref, b_ref, x_ref, o_ref):
    # w_ref, b_ref: (1,) f32 scalars in SMEM.
    # x_ref, o_ref: (tile_rows, 128) tiles in VMEM, native dtype.
    x = x_ref[...].astype(jnp.float32)           # cast on VPU, not in the wrapper
    o_ref[...] = (x * w_ref[0] + b_ref[0]).astype(o_ref.dtype)


def linear_forward(x, weight, bias):
    """PyTorch-style Linear(1, 1): x (B, 1), weight (1, 1), bias (1,) -> (B, 1)."""
    B, in_f = x.shape
    out_f, w_in = weight.shape
    assert in_f == 1 and out_f == 1 and w_in == 1, "this kernel implements Linear(1, 1)"
    dtype = x.dtype
    n = B * in_f

    # Scalar parameters -> f32 (8 bytes total; SMEM on the Pallas path).
    w_s = weight.reshape(1).astype(jnp.float32)
    b_s = bias.reshape(1).astype(jnp.float32)

    # Tiny batches: pad/reshape/pallas_call fixed overhead dwarfs the work.
    if n < _SMALL_BATCH_ELEMS:
        y = (x.astype(jnp.float32) * w_s[0] + b_s[0]).astype(dtype)
        return y.reshape(B, out_f)

    # Sublane multiple depends on dtype packing (f32 -> 8, bf16 -> 16, i8/fp8 -> 32).
    itemsize = jnp.dtype(dtype).itemsize
    sub = {4: 8, 2: 16, 1: 32}.get(itemsize, 8)

    # Lane-dense repack in native dtype: (B, 1) -> flat -> minimal pad -> (rows, 128).
    flat = x.reshape(-1)
    rows = pl.cdiv(n, _LANES)
    rows = pl.cdiv(rows, sub) * sub              # sublane-align only (no tile-align pad)
    padded = rows * _LANES
    if padded != n:
        flat = jnp.pad(flat, (0, padded - n))
    x2d = flat.reshape(rows, _LANES)

    # Tile size: as large as possible to amortize per-step overhead, but at
    # least 2 grid blocks whenever possible so v7x's two TCs both get work.
    tile_rows = min(_MAX_TILE_ROWS, rows)
    if tile_rows == rows and rows > sub:
        tile_rows = pl.cdiv(pl.cdiv(rows, 2), sub) * sub
    tile_rows = max(sub, (tile_rows // sub) * sub)

    grid = (pl.cdiv(rows, tile_rows),)           # ragged last block is masked by Pallas

    out2d = pl.pallas_call(
        _affine_kernel,
        out_shape=jax.ShapeDtypeStruct((rows, _LANES), dtype),
        grid=grid,
        in_specs=[
            pl.BlockSpec(memory_space=pltpu.MemorySpace.SMEM),    # weight scalar
            pl.BlockSpec(memory_space=pltpu.MemorySpace.SMEM),    # bias scalar
            pl.BlockSpec((tile_rows, _LANES), lambda i: (i, 0)),  # x tile
        ],
        out_specs=pl.BlockSpec((tile_rows, _LANES), lambda i: (i, 0)),
        compiler_params=pltpu.CompilerParams(
            dimension_semantics=("parallel",),
        ),
    )(w_s, b_s, x2d)

    return out2d.reshape(-1)[:n].reshape(B, out_f)


class Model:
    """JAX/Pallas equivalent of the PyTorch Model (Linear(1, 1))."""

    def __init__(self, key):
        # Mirror nn.Linear(1, 1) init: U(-1/sqrt(in), 1/sqrt(in)) with in_features=1.
        kw, kb = jax.random.split(key)
        bound = 1.0
        self.weight = jax.random.uniform(
            kw, (1, 1), dtype=jnp.float32, minval=-bound, maxval=bound
        )
        self.bias = jax.random.uniform(
            kb, (1,), dtype=jnp.float32, minval=-bound, maxval=bound
        )

    def __call__(self, x):
        return linear_forward(x, self.weight, self.bias)


if __name__ == "__main__":
    key = jax.random.PRNGKey(0)
    model = Model(key)

    def ref(x):
        return (x.astype(jnp.float32) @ model.weight.T + model.bias).astype(x.dtype)

    # Matches `hour_var = tensor([[4.0]])` from the original script: shape (1, 1).
    hour_var = jnp.array([[4.0]], dtype=jnp.float32)
    y_pred = jax.block_until_ready(model(hour_var))
    assert y_pred.shape == (1, 1)
    assert jnp.allclose(y_pred, ref(hour_var), atol=1e-6)

    # Small deterministic batch (short-circuit path).
    kx = jax.random.fold_in(key, 1)
    x_small = jax.random.normal(kx, (8, 1), dtype=jnp.float32)
    y_small = jax.block_until_ready(model(x_small))
    assert y_small.shape == (8, 1)
    assert jnp.allclose(y_small, ref(x_small), atol=1e-6)

    # Larger batch with a ragged tail: exercises the Pallas path, the minimal
    # padding, and a multi-block grid (>= 2 blocks for megacore sharding).
    kx2 = jax.random.fold_in(key, 2)
    x_large = jax.random.normal(kx2, (4133, 1), dtype=jnp.float32)
    y_large = jax.block_until_ready(model(x_large))
    assert y_large.shape == (4133, 1)
    assert jnp.allclose(y_large, ref(x_large), atol=1e-5)

    # bf16 input: exercises native-dtype load/store with in-kernel f32 compute.
    kx3 = jax.random.fold_in(key, 3)
    x_bf16 = jax.random.normal(kx3, (2048, 1), dtype=jnp.float32).astype(jnp.bfloat16)
    y_bf16 = jax.block_until_ready(model(x_bf16))
    assert y_bf16.shape == (2048, 1) and y_bf16.dtype == jnp.bfloat16
    assert jnp.allclose(y_bf16.astype(jnp.float32),
                        ref(x_bf16).astype(jnp.float32), atol=1e-2)

    print("KERNEL_OK")
</pallas_src>

<mosaic_0001>
module attributes {stable_mosaic.version = 11 : i64} {
  func.func @_affine_kernel(%arg0: i32, %arg1: memref<1xf32, #tpu.memory_space<smem>>, %arg2: memref<1xf32, #tpu.memory_space<smem>>, %arg3: memref<24x128xf32, #tpu.memory_space<vmem>>, %arg4: memref<24x128xf32, #tpu.memory_space<vmem>>) attributes {dimension_semantics = [#tpu.dimension_semantics<parallel>], iteration_bounds = array<i64: 2>, scalar_prefetch = 0 : i64, scratch_operands = 0 : i64, tpu.core_type = #tpu.core_type<tc>, window_params = [{transform_indices = @transform_0, window_bounds = array<i64: 1>}, {transform_indices = @transform_1, window_bounds = array<i64: 1>}, {transform_indices = @transform_2, window_bounds = array<i64: 24, 128>}, {transform_indices = @transform_3, window_bounds = array<i64: 24, 128>}]} {
    %c0 = arith.constant 0 : index
    %c0_0 = arith.constant 0 : index
    %0 = vector.load %arg3[%c0, %c0_0] : memref<24x128xf32, #tpu.memory_space<vmem>>, vector<24x128xf32>
    %c0_1 = arith.constant 0 : index
    %1 = memref.load %arg1[%c0_1] : memref<1xf32, #tpu.memory_space<smem>>
    %2 = vector.broadcast %1 : f32 to vector<24x128xf32>
    %3 = arith.mulf %0, %2 : vector<24x128xf32>
    %c0_2 = arith.constant 0 : index
    %4 = memref.load %arg2[%c0_2] : memref<1xf32, #tpu.memory_space<smem>>
    %5 = vector.broadcast %4 : f32 to vector<24x128xf32>
    %6 = arith.addf %3, %5 : vector<24x128xf32>
    %c0_3 = arith.constant 0 : index
    %c0_4 = arith.constant 0 : index
    %7 = vector.load %arg4[%c0_3, %c0_4] : memref<24x128xf32, #tpu.memory_space<vmem>>, vector<24x128xf32>
    tpu.vector_store %arg4[%c0_3, %c0_4], %6 {strides = array<i32>} : memref<24x128xf32, #tpu.memory_space<vmem>>, vector<24x128xf32>,
    return
  }
  func.func @transform_0(%arg0: i32) -> i32 {
    %c0_i32 = arith.constant 0 : i32
    %c0_i32_0 = arith.constant 0 : i32
    return %c0_i32 : i32
  }
  func.func @transform_1(%arg0: i32) -> i32 {
    %c0_i32 = arith.constant 0 : i32
    %c0_i32_0 = arith.constant 0 : i32
    return %c0_i32 : i32
  }
  func.func @transform_2(%arg0: i32) -> (i32, i32) {
    %c0_i32 = arith.constant 0 : i32
    %c0_i32_0 = arith.constant 0 : i32
    return %arg0, %c0_i32 : i32, i32
  }
  func.func @transform_3(%arg0: i32) -> (i32, i32) {
    %c0_i32 = arith.constant 0 : i32
    %c0_i32_0 = arith.constant 0 : i32
    return %arg0, %c0_i32 : i32, i32
  }
}

</mosaic_0001>

<bundles_post_ra>
// kernel: tpu_custom_call.1
= control target key start
LH: loop header
LB: loop body
LE: loop exit
PB: predicated region body
PF: predicated region fallthrough
CT: control target
= control target key end

     0   :  { %s708_s0 = inlined_call_operand.<no memory space> [shape: f32[1], index: 0, kind: input, shape index: {}]   ;;  %s709_s1 = inlined_call_operand.<no memory space> [shape: f32[1], index: 1, kind: input, shape index: {}]   ;;  %s710_s2 = inlined_call_operand.hbm [shape: f32[40,128], index: 2, kind: input, shape index: {}]   ;;  %s711_s3 = inlined_call_operand.hbm [shape: f32[40,128], index: 3, kind: output, shape index: {}]  }
   0x1   :  { %8 = sst [smem:[#allocation2]] %s708_s0 }
   0x2   :  { %9 = sst [smem:[#allocation3]] %s709_s1 }
   0x3   :  { %10 = vsyncpa [#allocation5], 0 }
   0x4   :  { %12 = vsyncpa [#allocation5 + $0x1], 0 }
   0x5   :  { %13 = vsyncpa [#allocation6], 0 }
   0x6   :  { %15 = vsyncpa [#allocation6 + $0x1], 0  ;;  %s535_s16 = smov 0   ;;  %s537_s17 = smov 0  }
   0x7   :  { %s539_s18 = smov 0   ;;  %s541_s19 = smov 0  }
   0x8 LB: > { %s556_s0 = sadd.s32 4294967295, %s501_s19   ;;  %s322_s1 = sadd.s32 4294967294, %s501_s19   ;;  %s501_s19 = sphi %s541_s19, %s722_s19   ;;  %s497_s18 = sphi %s539_s18, %s721_s18   ;;  %s493_s17 = sphi %s537_s17, %s720_s17   ;;  %s489_s16 = sphi %s535_s16, %s719_s16  }
   0x9   : > { %s560_s20 = sadd.s32 1, %s501_s19   ;;  %s70_s21 = sadd.s32 1, %s497_s18 }
   0xa   : > { %s67_s22 = ssub.s32 %s501_s19, %s560_s20  ;;  %p77_p0 = scmp.ne.s32.totalorder %s497_s18, %s493_s17 }
   0xb   : > { %p68_p1 = scmp.eq.s32.totalorder %s67_s22, 0  ;;  %p78_p2 = scmp.eq.s32.totalorder %s501_s19, 0 }
   0xc   : > { %p83_p3 = scmp.ne.s32.totalorder %s493_s17, %s489_s16  ;;  %p84_p4 = scmp.eq.s32.totalorder %s556_s0, 0 }
   0xd   : > { %s572_s23 = scalar_select %p68_p1, %s497_s18, %s70_s21  }
   0xe   : > { %p79_p5 = por %p78_p2, %p77_p0  ;;  %p574_p6 = por %p84_p4, %p83_p3 }
   0xf   : > { %p107_p7 = scmp.eq.s32.totalorder %s556_s0, 1  ;;  %p113_p8 = scmp.eq.s32.totalorder %s322_s1, 1 }
  0x10   : > { %p712_p11 = scmp.ge.s32.totalorder %s501_s19, 2 }
  0x11   : > { %p579_p9 = por %p107_p7, %p77_p0  ;;  %p583_p10 = por %p113_p8, %p83_p3 }
  0x12   : > { %135 = sbr.rel (%p712_p11) target bundleno = 61 (0x3d), region = 24 }
  0x17   : > { %138 = sbr.rel (!%p79_p5) target bundleno = 61 (0x3d), region = 28  ;;  %s139_s27 = sand.u32 (%p79_p5), 1, %s497_s18  }
  0x18   : > { %s144_s28 = smul.u32 (%p79_p5), 3, %s501_s19  ;;  %s595_s7 = scalar_lea.sflag (%p79_p5), [#allocation5], %s139_s27 }
  0x19   : > { %s340_s29 = smul.u32 (%p79_p5), 24, %s139_s27 }
  0x1a   : > { %s145_s30 = ssub.s32 (%p79_p5), 5, %s144_s28 }
  0x1b   : > { %p146_p12 = scmp.lt.s32.totalorder (%p79_p5), %s145_s30, 3  ;;  %s143_s8 = scalar_lea.vmem (%p79_p5), [#allocation4], %s340_s29 }
  0x1d   : > { %s724_s30 = smov (!%p146_p12, %s145_s30), 3 }
  0x1e   : > { %s325_s4 = sshll.u32 %s724_s30, 3 }
  0x1f   : > { %s149_s5 = ssub.s32 24, %s325_s4 }
  0x20   : > { %s150_s6 = sshll.u32 %s149_s5, 4 }
  0x21   : > { %151 = vsyncadd %s595_s7, %s150_s6  ;;  %p598_p13 = scmp.ne.s32.totalorder %s325_s4, 0  ;;  %s338_s10 = smul.u32 24, %s501_s19 }
  0x22   : > { %s603_s11 = sshll.u32 %s143_s8, 4  ;;  %s329_s12 = sshll.u32 %s724_s30, 7  ;;  %s159_s11 = int_to_ptr.vmem [resolvable:$true] %s603_s11 }
  0x23   : > { %s154_s15 = scalar_lea.hbm %s710_s2, %s338_s10  ;;  %s387_s22 = sshrl.u32 %s329_s12, 4 }
  0x24   : > { %s156_s1 = sshll.u32 %s154_s15, 4  ;;  %s396_s4 = scalar_lea.hbm %s710_s2, 40  ;;  %s610_s1 = int_to_ptr.hbm [resolvable:$true] %s156_s1 }
  0x25   : > { %s385_s21 = sshra.s32 %s610_s1, 4  ;;  %s386_s21 = int_to_ptr.hbm [resolvable:$true] %s385_s21 }
  0x26   : > { %s392_s27 = scalar_lea.hbm %s386_s21, %s387_s22  ;;  %p397_p3 = scmp.lt.s32.totalorder %s386_s21, %s710_s2 }
  0x27   : > { %p393_p0 = scmp.ne.s32.totalorder %s386_s21, %s392_s27  ;;  %p398_p4 = scmp.lt.s32.totalorder %s396_s4, %s392_s27 }
  0x29   : > { %p394_p1 = pnand %p393_p0, %p598_p13  ;;  %p399_p5 = por %p398_p4, %p397_p3 }
  0x2b   : > { %p395_p2 = pneg %p394_p1 }
  0x2d   : > { %p400_p7 = pnand %p399_p5, %p395_p2 }
  0x2f   : > { %403 = shalt.err (!%p400_p7)
}
  0x30   : > { %s404_s8 = sshra.s32 %s159_s11, 4  ;;  %s503_s13 = smov [#allocation4]   ;;  %s405_s8 = int_to_ptr.vmem [resolvable:$true] %s404_s8 }
  0x31   : > { %s411_s10 = scalar_lea.vmem %s405_s8, %s387_s22  ;;  %s415_s14 = scalar_lea.vmem %s503_s13, 48 }
  0x32   : > { %p412_p8 = scmp.ne.s32.totalorder %s405_s8, %s411_s10  ;;  %p417_p1 = scmp.lt.s32.totalorder %s415_s14, %s411_s10 }
  0x34   : > { %p413_p12 = pnand %p412_p8, %p598_p13 }
  0x36   : > { %p414_p0 = pneg %p413_p12 }
  0x38   : > { %p419_p11 = pnand %p417_p1, %p414_p0 }
  0x3a   : > { %422 = shalt.err (!%p419_p11)
}
  0x3b   : > { %s504_s15 = smov 128   ;;  %s505_s21 = smov 8  }
  0x3c   : > { %164 = dma.hbm_to_vmem [thread:$0]  (%p598_p13), %s610_s1, %s329_s12, %s159_s11, %s595_s7, %s504_s15, %s504_s15, %s505_s21  }
  0x3d PF: > { %p330_p2 = scmp.ge.s32.totalorder %s501_s19, 1  ;;  %p166_p3 = scmp.lt.s32.totalorder %s501_s19, 3 }
  0x3f   : > { %p167_p4 = pnand %p330_p2, %p166_p3 }
  0x40   : > { %s638_s22 = sand.u32 (!%p167_p4), 1, %s493_s17  }
  0x41   : > { %170 = sbr.rel (%p167_p4) target bundleno = 116 (0x74), region = 32  ;;  %s173_s28 = scalar_lea.sflag (!%p167_p4), [#allocation5], %s638_s22 }
  0x42   : > { %s341_s27 = smul.u32 (!%p167_p4), 24, %s638_s22 }
  0x44   : > { %s176_s9 = scalar_lea.vmem (!%p167_p4), [#allocation4], %s341_s27 }
  0x46   : > { %480 = dma.done.wait (%p574_p6), %s173_s28, 384  }
  0x47   : > { %482 = vsyncadd (%p574_p6), %s173_s28, 4294966912  ;;  %s213_s30 = sld [smem:[#allocation2]]  ;;  %v210_v0 = vld [vmem:[%s176_s9] sm:$0xff]  ;;  %v211_v2 = vld [vmem:[%s176_s9 + $0x8] sm:$0xff]  ;;  %s199_s11 = scalar_lea.vmem [#allocation7], %s341_s27 }
  0x48   : > { %s218_s7 = sld [smem:[#allocation3]]  ;;  %v212_v3 = vld [vmem:[%s176_s9 + $0x10] sm:$0xff]  ;;  %s227_s24 = scalar_lea.sflag [#allocation6], %s638_s22 }
  0x49   : > { %s234_s12 = smul.u32 (%p579_p9), 3, %s556_s0 }
  0x4b   : > { %s235_s1 = ssub.s32 (%p579_p9), 5, %s234_s12 }
  0x4c   : > { %p236_p6 = scmp.lt.s32.totalorder (%p579_p9), %s235_s1, 3 }
  0x4d   : > { %v214_v1 = vstv %s213_s30 }
  0x4e   : > { %v215_v4 = vmul.f32 %v214_v1, %v210_v0  ;;  %v219_v5 = vstv %s218_s7  ;;  %v216_v6 = vmul.f32 %v214_v1, %v211_v2  ;;  %v217_v7 = vmul.f32 %v214_v1, %v212_v3 }
  0x50   : > { %v220_v8 = vadd.f32 %v219_v5, %v215_v4  ;;  %v221_v9 = vadd.f32 %v219_v5, %v216_v6  ;;  %v222_v10 = vadd.f32 %v219_v5, %v217_v7  ;;  %233 = sbr.rel (!%p579_p9) target bundleno = 116 (0x74), region = 40 }
  0x52   : > { %223 = vst [vmem:[%s199_s11] sm:$0xff] %v220_v8 }
  0x53   : > { %224 = vst [vmem:[%s199_s11 + $0x8] sm:$0xff] %v221_v9 }
  0x54   : > { %225 = vst [vmem:[%s199_s11 + $0x10] sm:$0xff] %v222_v10 }
  0x55   : > { %s726_s1 = smov (!%p236_p6, %s235_s1), 3 }
  0x56   : > { %s331_s29 = sshll.u32 %s726_s1, 3 }
  0x57   : > { %s239_s4 = ssub.s32 24, %s331_s29 }
  0x58   : > { %s240_s5 = sshll.u32 %s239_s4, 4 }
  0x59   : > { %241 = vsyncadd %s227_s24, %s240_s5  ;;  %p655_p11 = scmp.ne.s32.totalorder %s331_s29, 0  ;;  %s339_s25 = smul.u32 24, %s556_s0 }
  0x5a   : > { %s246_s8 = sshll.u32 %s199_s11, 4  ;;  %s335_s10 = sshll.u32 %s726_s1, 7  ;;  %s664_s8 = int_to_ptr.vmem [resolvable:$true] %s246_s8 }
  0x5b   : > { %s244_s15 = scalar_lea.hbm %s711_s3, %s339_s25  ;;  %s424_s27 = sshra.s32 %s664_s8, 4  ;;  %s425_s27 = int_to_ptr.vmem [resolvable:$true] %s424_s27 }
  0x5c   : > { %s248_s21 = sshll.u32 %s244_s15, 4  ;;  %s426_s28 = sshrl.u32 %s335_s10, 4  ;;  %s666_s21 = int_to_ptr.hbm [resolvable:$true] %s248_s21 }
  0x5d   : > { %s431_s9 = scalar_lea.vmem %s425_s27, %s426_s28  ;;  %s506_s0 = smov [#allocation7]  }
  0x5e   : > { %p432_p9 = scmp.ne.s32.totalorder %s425_s27, %s431_s9  ;;  %s435_s30 = scalar_lea.vmem %s506_s0, 48 }
  0x5f   : > { %p437_p7 = scmp.lt.s32.totalorder %s435_s30, %s431_s9 }
  0x60   : > { %p433_p13 = pnand %p432_p9, %p655_p11 }
  0x62   : > { %p434_p5 = pneg %p433_p13 }
  0x64   : > { %p439_p8 = pnand %p437_p7, %p434_p5 }
  0x66   : > { %442 = shalt.err (!%p439_p8)
}
  0x67   : > { %s443_s7 = sshra.s32 %s666_s21, 4  ;;  %s454_s4 = scalar_lea.hbm %s711_s3, 40  ;;  %s444_s7 = int_to_ptr.hbm [resolvable:$true] %s443_s7 }
  0x68   : > { %s450_s11 = scalar_lea.hbm %s444_s7, %s426_s28  ;;  %p455_p2 = scmp.lt.s32.totalorder %s444_s7, %s711_s3 }
  0x69   : > { %p451_p12 = scmp.ne.s32.totalorder %s444_s7, %s450_s11  ;;  %p456_p3 = scmp.lt.s32.totalorder %s454_s4, %s450_s11 }
  0x6b   : > { %p452_p0 = pnand %p451_p12, %p655_p11  ;;  %p457_p4 = por %p456_p3, %p455_p2 }
  0x6d   : > { %p453_p1 = pneg %p452_p0 }
  0x6f   : > { %p458_p6 = pnand %p457_p4, %p453_p1 }
  0x71   : > { %461 = shalt.err (!%p458_p6)
}
  0x72   : > { %s507_s13 = smov 128   ;;  %s508_s14 = smov 8  }
  0x73   : > { %254 = dma.vmem_to_hbm [thread:$0]  (%p655_p11), %s664_s8, %s335_s10, %s666_s21, %s227_s24, %s507_s13, %s507_s13, %s508_s14  }
  0x74 PF: > { %s263_s15 = sand.u32 1, %s489_s16   ;;  %p718_p9 = scmp.ge.s32.totalorder %s501_s19, 2 }
  0x75   : > { %s264_s27 = scalar_lea.sflag [#allocation6], %s263_s15 }
  0x76   : > { %p345_p13 = pnand %p718_p9, %p583_p10 }
  0x78   : > { %p346_p5 = pneg %p345_p13 }
  0x7a   : > { %484 = dma.done.wait (%p346_p5), %s264_s27, 384  }
  0x7b   : > { %486 = vsyncadd (%p346_p5), %s264_s27, 4294966912  ;;  %p18_p7 = scmp.ge.s32.totalorder %s560_s20, 4   ;;  %s719_s16 = smov %s493_s17 }
  0x7c   : > { %s720_s17 = smov %s497_s18  ;;  %s721_s18 = smov %s572_s23 }
  0x7d   : > { %s722_s19 = smov %s560_s20  ;;  %20 = sbr.rel (!%p18_p7) target bundleno = 8 (0x8), region = 77 }
  0x82   :  { %270 = vsyncpa [#allocation5], 1 }
  0x83   :  { %272 = vsyncpa [#allocation5 + $0x1], 1 }
  0x84   :  { %273 = vsyncpa [#allocation6], 1 }
  0x85   :  { %275 = vsyncpa [#allocation6 + $0x1], 1 }

</bundles_post_ra>
